<compile_context>
chip_gen: v6e
topology: v6e:2x2x1
jax: 0.10.0
libtpu: 0.0.40
codegen_flags: <defaults>
</compile_context>

<pallas_src>
import jax
import jax.numpy as jnp
from jax import lax
from jax.experimental import pallas as pl
from jax.experimental.pallas import tpu as pltpu


def _qnet_kernel(x_ref, w1_ref, b1_ref, w2_ref, b2_ref, o_ref):
    """Fused 2-layer MLP on one batch tile, natural (batch, feature) layout.

    x_ref  : (TB, D_in)  streamed activation tile (original dtype)
    w1_ref : (H, D_in)   PyTorch linear1.weight layout (resident, mxu dtype)
    b1_ref : (1, H)      f32 bias row
    w2_ref : (O, H)      PyTorch linear2.weight layout (resident, mxu dtype)
    b2_ref : (1, O)      f32 bias row
    o_ref  : (TB, O)     output tile, written in the module's natural layout
    """
    # In-kernel cast to the MXU input dtype (no-op when mxu_dtype is None);
    # cheap VPU work hidden under the tile DMA, instead of a wrapper HBM pass.
    x = x_ref[...].astype(w1_ref.dtype)

    # h = x @ W1.T  -> (TB, H), f32 accumulation on the MXU.
    h = lax.dot_general(x, w1_ref[...],
                        dimension_numbers=(((1,), (1,)), ((), ())),
                        preferred_element_type=jnp.float32)
    # Bias + ReLU in f32 (v5e's VPU has no bf16 path; dot already yields f32).
    h = jnp.maximum(h + b1_ref[...], 0.0)

    # y = h @ W2.T  -> (TB, O); cast h back to the MXU dtype, accumulate f32.
    y = lax.dot_general(h.astype(w2_ref.dtype), w2_ref[...],
                        dimension_numbers=(((1,), (1,)), ((), ())),
                        preferred_element_type=jnp.float32)
    o_ref[...] = (y + b2_ref[...]).astype(o_ref.dtype)


def _ceil_to(x, m):
    return -(-x // m) * m


def _padded_tile_bytes(rows, cols, dtype):
    """(rows, cols) VMEM tile footprint with dtype-aware (sublane, 128) pad."""
    d = jnp.dtype(dtype)
    sublane = max(8, 32 // d.itemsize)          # 8 for f32, 16 for bf16, ...
    return _ceil_to(rows, sublane) * _ceil_to(cols, 128) * d.itemsize


def _pick_block_batch(batch, cap=16384):
    """Lane-aligned batch tile (multiple of 128), as large as possible.

    For large batches prefer an even 2-step grid so v7x can shard the
    "parallel" axis across its 2 TensorCores; otherwise take the biggest
    128-multiple divisor of `batch` up to `cap`.  Small / irregular batches
    use one full-width block.
    """
    if batch % 128 != 0:
        return batch
    half = batch // 2
    if half >= 128 and half % 128 == 0 and half <= cap:
        return half                               # even 2-step grid
    for cand in (16384, 8192, 4096, 2048, 1024, 512, 256, 128):
        if cand <= cap and batch % cand == 0:
            return cand
    return batch


def qnet_forward(x, w1, b1, w2, b2, *, block_batch=None, mxu_dtype=jnp.bfloat16):
    """Fused Linear_QNet forward:  y = relu(x @ w1.T + b1) @ w2.T + b2.

    Shapes follow PyTorch nn.Linear conventions:
      x: (B, D_in), w1: (H, D_in), b1: (H,), w2: (O, H), b2: (O,).
    Returns (B, O) in x.dtype.

    mxu_dtype: dtype fed to the MXU (bf16 recommended on v6e/v7x). Pass None
    to keep the input dtype end-to-end (e.g. strict f32 comparisons).
    """
    B, D_in = x.shape
    H, _ = w1.shape
    O, _ = w2.shape
    out_dtype = x.dtype

    if block_batch is None:
        block_batch = _pick_block_batch(B)
    assert B % block_batch == 0, "batch must be divisible by block_batch"
    # Batch is the sublane (second-last) dim of the streamed blocks: it must
    # be a multiple of 128 or cover the full batch.
    assert block_batch == B or block_batch % 128 == 0, (
        "block_batch must equal the batch size or be a multiple of 128")

    if mxu_dtype is not None:
        # Unconditional weight cast: weights are tiny and resident, and this
        # guarantees both dot operands share the MXU dtype (no mixed f32xbf16
        # promotion).  The x tile is cast inside the kernel instead.
        w1 = w1.astype(mxu_dtype)
        w2 = w2.astype(mxu_dtype)

    b1r = b1.astype(jnp.float32).reshape(1, H)
    b2r = b2.astype(jnp.float32).reshape(1, O)

    grid = (B // block_batch,)

    # Honest VMEM budget: double-buffered streamed tiles + (double-buffered)
    # resident params, dtype-aware (sublane, 128) padding, ~2 MiB headroom,
    # clamped to v7x's 64 MiB physical VMEM.
    stream = 2 * (_padded_tile_bytes(block_batch, D_in, x.dtype)
                  + _padded_tile_bytes(block_batch, O, out_dtype))
    resident = 2 * (_padded_tile_bytes(H, D_in, w1.dtype)
                    + _padded_tile_bytes(O, H, w2.dtype)
                    + _padded_tile_bytes(1, H, jnp.float32)
                    + _padded_tile_bytes(1, O, jnp.float32))
    vmem_limit = min(max(stream + resident + (2 << 20), 4 << 20), 64 << 20)

    return pl.pallas_call(
        _qnet_kernel,
        out_shape=jax.ShapeDtypeStruct((B, O), out_dtype),
        grid=grid,
        in_specs=[
            pl.BlockSpec((block_batch, D_in), lambda i: (i, 0)),  # x tile (streamed)
            pl.BlockSpec((H, D_in), lambda i: (0, 0)),            # w1 (resident)
            pl.BlockSpec((1, H), lambda i: (0, 0)),               # b1 (resident)
            pl.BlockSpec((O, H), lambda i: (0, 0)),               # w2 (resident)
            pl.BlockSpec((1, O), lambda i: (0, 0)),               # b2 (resident)
        ],
        out_specs=pl.BlockSpec((block_batch, O), lambda i: (i, 0)),
        compiler_params=pltpu.CompilerParams(
            dimension_semantics=("parallel",),  # v7x shards steps across 2 TCs
            vmem_limit_bytes=vmem_limit,
        ),
    )(x, w1, b1r, w2, b2r)


def _reference(x, w1, b1, w2, b2):
    h = jnp.maximum(x @ w1.T + b1, 0.0)
    return h @ w2.T + b2


if __name__ == "__main__":
    # Shapes consistent with Linear_QNet(input_size, hidden_size, output_size).
    input_size, hidden_size, output_size = 16, 32, 4

    key = jax.random.PRNGKey(0)
    k_x, k_w1, k_b1, k_w2, k_b2 = jax.random.split(key, 5)

    # Deterministic synthetic parameters (PyTorch-like uniform init scale),
    # stored in the PyTorch nn.Linear (out_features, in_features) layout.
    bound1 = 1.0 / (input_size ** 0.5)
    bound2 = 1.0 / (hidden_size ** 0.5)
    w1 = jax.random.uniform(k_w1, (hidden_size, input_size),
                            minval=-bound1, maxval=bound1, dtype=jnp.float32)
    b1 = jax.random.uniform(k_b1, (hidden_size,),
                            minval=-bound1, maxval=bound1, dtype=jnp.float32)
    w2 = jax.random.uniform(k_w2, (output_size, hidden_size),
                            minval=-bound2, maxval=bound2, dtype=jnp.float32)
    b2 = jax.random.uniform(k_b2, (output_size,),
                            minval=-bound2, maxval=bound2, dtype=jnp.float32)

    # --- small batch, exact f32 path (single full-width block) ---
    x_small = jax.random.normal(k_x, (8, input_size), dtype=jnp.float32)
    out_small = jax.block_until_ready(
        qnet_forward(x_small, w1, b1, w2, b2, mxu_dtype=None))
    ref_small = _reference(x_small, w1, b1, w2, b2)
    assert out_small.shape == (8, output_size)
    assert jnp.allclose(out_small, ref_small, atol=1e-5, rtol=1e-5), \
        "f32 path mismatch vs reference"

    # --- larger batch: even 2-step parallel grid (512-row tiles) + bf16 MXU ---
    x_big = jax.random.normal(k_x, (1024, input_size), dtype=jnp.float32)
    out_big = jax.block_until_ready(qnet_forward(x_big, w1, b1, w2, b2))
    ref_big = _reference(x_big, w1, b1, w2, b2)
    assert out_big.shape == (1024, output_size)
    assert jnp.allclose(out_big, ref_big, atol=1e-1, rtol=1e-1), \
        "bf16 path mismatch vs reference"

    print("KERNEL_OK")
</pallas_src>

<mosaic_0001>
module attributes {stable_mosaic.version = 11 : i64} {
  func.func @_qnet_kernel(%arg0: i32, %arg1: memref<8x16xf32, #tpu.memory_space<vmem>>, %arg2: memref<32x16xf32, #tpu.memory_space<vmem>>, %arg3: memref<1x32xf32, #tpu.memory_space<vmem>>, %arg4: memref<4x32xf32, #tpu.memory_space<vmem>>, %arg5: memref<1x4xf32, #tpu.memory_space<vmem>>, %arg6: memref<8x4xf32, #tpu.memory_space<vmem>>) attributes {dimension_semantics = [#tpu.dimension_semantics<parallel>], iteration_bounds = array<i64: 1>, scalar_prefetch = 0 : i64, scratch_operands = 0 : i64, tpu.core_type = #tpu.core_type<tc>, window_params = [{transform_indices = @transform_0, window_bounds = array<i64: 8, 16>}, {pipeline_mode = #tpu.pipeline_mode<synchronous>, transform_indices = @transform_1, window_bounds = array<i64: 32, 16>}, {pipeline_mode = #tpu.pipeline_mode<synchronous>, transform_indices = @transform_2, window_bounds = array<i64: 1, 32>}, {pipeline_mode = #tpu.pipeline_mode<synchronous>, transform_indices = @transform_3, window_bounds = array<i64: 4, 32>}, {pipeline_mode = #tpu.pipeline_mode<synchronous>, transform_indices = @transform_4, window_bounds = array<i64: 1, 4>}, {transform_indices = @transform_5, window_bounds = array<i64: 8, 4>}]} {
    %c0 = arith.constant 0 : index
    %c0_0 = arith.constant 0 : index
    %0 = vector.load %arg1[%c0, %c0_0] : memref<8x16xf32, #tpu.memory_space<vmem>>, vector<8x16xf32>
    %c0_1 = arith.constant 0 : index
    %c0_2 = arith.constant 0 : index
    %1 = vector.load %arg2[%c0_1, %c0_2] : memref<32x16xf32, #tpu.memory_space<vmem>>, vector<32x16xf32>
    %cst = arith.constant dense<0.000000e+00> : vector<8x32xf32>
    %2 = tpu.matmul %0, %1, %cst {dimension_numbers = #tpu.dot_dimension_numbers<[1], [1], [0], [0], [0, 0, 1, 0], [], []>} : vector<8x16xf32>, vector<32x16xf32>, vector<8x32xf32> -> vector<8x32xf32>
    %c0_3 = arith.constant 0 : index
    %c0_4 = arith.constant 0 : index
    %3 = vector.load %arg3[%c0_3, %c0_4] : memref<1x32xf32, #tpu.memory_space<vmem>>, vector<1x32xf32>
    %4 = vector.broadcast %3 : vector<1x32xf32> to vector<8x32xf32>
    %5 = arith.addf %2, %4 : vector<8x32xf32>
    %cst_5 = arith.constant 0.000000e+00 : f32
    %6 = vector.broadcast %cst_5 : f32 to vector<8x32xf32>
    %7 = arith.maximumf %5, %6 : vector<8x32xf32>
    %c0_6 = arith.constant 0 : index
    %c0_7 = arith.constant 0 : index
    %8 = vector.load %arg4[%c0_6, %c0_7] : memref<4x32xf32, #tpu.memory_space<vmem>>, vector<4x32xf32>
    %cst_8 = arith.constant dense<0.000000e+00> : vector<8x4xf32>
    %9 = tpu.matmul %7, %8, %cst_8 {dimension_numbers = #tpu.dot_dimension_numbers<[1], [1], [0], [0], [0, 0, 1, 0], [], []>} : vector<8x32xf32>, vector<4x32xf32>, vector<8x4xf32> -> vector<8x4xf32>
    %c0_9 = arith.constant 0 : index
    %c0_10 = arith.constant 0 : index
    %10 = vector.load %arg5[%c0_9, %c0_10] : memref<1x4xf32, #tpu.memory_space<vmem>>, vector<1x4xf32>
    %11 = vector.broadcast %10 : vector<1x4xf32> to vector<8x4xf32>
    %12 = arith.addf %9, %11 : vector<8x4xf32>
    %c0_11 = arith.constant 0 : index
    %c0_12 = arith.constant 0 : index
    %13 = vector.load %arg6[%c0_11, %c0_12] : memref<8x4xf32, #tpu.memory_space<vmem>>, vector<8x4xf32>
    tpu.vector_store %arg6[%c0_11, %c0_12], %12 {strides = array<i32>} : memref<8x4xf32, #tpu.memory_space<vmem>>, vector<8x4xf32>,
    return
  }
  func.func @transform_0(%arg0: i32) -> (i32, i32) {
    %c0_i32 = arith.constant 0 : i32
    %c0_i32_0 = arith.constant 0 : i32
    return %arg0, %c0_i32 : i32, i32
  }
  func.func @transform_1(%arg0: i32) -> (i32, i32) {
    %c0_i32 = arith.constant 0 : i32
    %c0_i32_0 = arith.constant 0 : i32
    %c0_i32_1 = arith.constant 0 : i32
    return %c0_i32, %c0_i32_0 : i32, i32
  }
  func.func @transform_2(%arg0: i32) -> (i32, i32) {
    %c0_i32 = arith.constant 0 : i32
    %c0_i32_0 = arith.constant 0 : i32
    %c0_i32_1 = arith.constant 0 : i32
    return %c0_i32, %c0_i32_0 : i32, i32
  }
  func.func @transform_3(%arg0: i32) -> (i32, i32) {
    %c0_i32 = arith.constant 0 : i32
    %c0_i32_0 = arith.constant 0 : i32
    %c0_i32_1 = arith.constant 0 : i32
    return %c0_i32, %c0_i32_0 : i32, i32
  }
  func.func @transform_4(%arg0: i32) -> (i32, i32) {
    %c0_i32 = arith.constant 0 : i32
    %c0_i32_0 = arith.constant 0 : i32
    %c0_i32_1 = arith.constant 0 : i32
    return %c0_i32, %c0_i32_0 : i32, i32
  }
  func.func @transform_5(%arg0: i32) -> (i32, i32) {
    %c0_i32 = arith.constant 0 : i32
    %c0_i32_0 = arith.constant 0 : i32
    return %arg0, %c0_i32 : i32, i32
  }
}

</mosaic_0001>

<bundles_post_ra>
// kernel: tpu_custom_call.1
= control target key start
LH: loop header
LB: loop body
LE: loop exit
PB: predicated region body
PF: predicated region fallthrough
CT: control target
= control target key end

     0   :  { %vm32_vm0 = vcmask 130048   ;;  %v244_v0 = vmov 0.0   ;;  %vm245_vm1 = vmmov 0   ;;  %vm127_vm2 = vcmask 261120   ;;  %s308_s1 = inlined_call_operand.vmem [shape: f32[32,16], index: 1, kind: input, shape index: {}]   ;;  %s309_s0 = inlined_call_operand.vmem [shape: f32[8,16], index: 0, kind: input, shape index: {}]   ;;  %s310_s3 = inlined_call_operand.vmem [shape: f32[4,32], index: 3, kind: input, shape index: {}]   ;;  %s311_s2 = inlined_call_operand.vmem [shape: f32[1,32], index: 2, kind: input, shape index: {}]   ;;  %s312_s4 = inlined_call_operand.vmem [shape: f32[1,4], index: 4, kind: input, shape index: {}]   ;;  %s313_s5 = inlined_call_operand.vmem [shape: f32[8,4], index: 5, kind: output, shape index: {}]  }
   0x1   :  { %226 = vmatprep.subr.mxu0 %v244_v0  ;;  %v24_v1 = vld [vmem:[%s308_s1 + $0x18] sm:$0xff]  ;;  %234 = vmatprep.mubr.msk.f32.mxu0 %vm245_vm1, %v244_v0  ;;  %v23_v2 = vld [vmem:[%s308_s1 + $0x10] sm:$0xff]  ;;  %v22_v3 = vld [vmem:[%s308_s1 + $0x8] sm:$0xff]  ;;  %vm204_vm3 = vcmask 31744  }
   0x2   :  { %227 = vmatpush3.xpose.msk.msra.mxu0 %vm32_vm0, %v24_v1  ;;  %237 = vmatprep.subr.mxu1 %v244_v0  ;;  %v21_v4 = vld [vmem:[%s308_s1] sm:$0xff] }
   0x3   :  { %228 = vmatprep.subr.mxu0 %v244_v0  ;;  %239 = vmatprep.mubr.msk.f32.mxu1 %vm245_vm1, %v244_v0  ;;  %v20_v5 = vld [vmem:[%s309_s0] sm:$0xff] }
   0x4   :  { %v119_v6 = vld [vmem:[%s310_s3] sm:$0xf] }
   0x5   :  { %238 = vmatpush3.xpose.msk.msra.mxu1 %vm127_vm2, %v119_v6  ;;  %v210_v7 = vld [vmem:[%s311_s2] ss:$0 sm:$0xff] }
   0x6   :  { %229 = vmatpush3.xpose.msk.msra.mxu0 %vm32_vm0, %v23_v2  ;;  %v216_v12 = vld [vmem:[%s312_s4] ss:$0 sm:$0xff] }
   0x7   :  { %230 = vmatprep.subr.mxu0 %v244_v0 }
   0xa   :  { %231 = vmatpush3.xpose.msk.msra.mxu0 %vm32_vm0, %v22_v3 }
   0xb   :  { %232 = vmatprep.subr.mxu0 %v244_v0 }
   0xe   :  { %233 = vmatpush3.xpose.msk.msra.mxu0 %vm32_vm0, %v21_v4 }
  0x11   :  { %235 = vmatmul.mubr.msk.f32.vlgmr.msra.gmra.mxu0 %vm32_vm0, %v20_v5 }
  0xd1   :  { %v114_v8 = vpop.f32.mrf.mxu0 }
  0xd2   :  { %v115_v9 = vadd.f32 %v210_v7, %v114_v8 }
  0xd3   :  { %v236_v10 = vpop.f32.mrf.mxu0 }
  0xd4   :  { %v118_v11 = vmax.f32 %v115_v9, 0.0 }
  0xd6   :  { %240 = vmatmul.mubr.msk.f32.vlgmr.msra.gmra.mxu1 %vm127_vm2, %v118_v11 }
 0x196   :  { %v200_v13 = vpop.f32.mrf.mxu1 }
 0x197   :  { %v201_v14 = vadd.f32 %v216_v12, %v200_v13 }
 0x198   :  { %v241_v15 = vpop.f32.mrf.mxu1 }
 0x199   :  { %205 = vst.msk [vmem:[%s313_s5] sm:$0xff] %vm204_vm3, %v201_v14 }

</bundles_post_ra>
